<compile_context>
chip_gen: v5e
topology: v5e:2x2
jax: 0.10.0
libtpu: 0.0.40
codegen_flags: <defaults>
</compile_context>

<pallas_src>
import jax
import jax.numpy as jnp
import numpy as np
from jax.experimental import pallas as pl
from jax.experimental.pallas import tpu as pltpu


# ----------------------------------------------------------------------------
# Weight packing: one contiguous (R, 4H) slab instead of 3*n_layers + 2 inputs.
# ----------------------------------------------------------------------------
def _pack_params(params, n_layers, H):
    pieces, layer_offs = [], []
    cur = 0

    def _add(block):
        nonlocal cur
        pad = (-block.shape[0]) % 8          # 8-row (sublane) alignment per piece
        if pad:
            block = jnp.pad(block, ((0, pad), (0, 0)))
        pieces.append(block)
        off = cur
        cur += block.shape[0]
        return off

    for l in range(n_layers):
        o_ih = _add(params["w_ih"][l])       # (in_dim, 4H)
        o_hh = _add(params["w_hh"][l])       # (H, 4H)
        o_b = _add(params["b"][l])           # (1, 4H)
        layer_offs.append((o_ih, o_hh, o_b))

    # Head row: w_lin in lanes [0:H], b_lin at lane H (4H >= H+1 always).
    head = jnp.zeros((1, 4 * H), jnp.float32)
    head = head.at[0, :H].set(params["w_lin"][0])
    head = head.at[0, H].set(params["b_lin"][0, 0])
    head_off = _add(head)

    return jnp.concatenate(pieces, axis=0), layer_offs, head_off


# ----------------------------------------------------------------------------
# Pallas kernel (one grid program == one independent forward pass)
# ----------------------------------------------------------------------------
def _make_kernel(n_layers, T, B, F, H, layer_offs, head_off, in_dims):
    # Flat rows consumed by the head:  lstm_out.view(B, T, H)[-1]  ==  rows
    # (B-1)*T .. (B-1)*T + T - 1 of the flat (T*B, H) sequence.
    last_tb = [divmod((B - 1) * T + j, B) for j in range(T)]   # (t, b) per output row

    def kernel(x_ref, w_ref, out_ref):
        layer_in = x_ref[...]                                  # (T*B, F)
        last_slices = [None] * T

        # --- stacked LSTM (layers and timesteps fully unrolled) ---------------
        for layer in range(n_layers):
            in_dim = in_dims[layer]
            o_ih, o_hh, o_b = layer_offs[layer]
            w_ih_l = w_ref[o_ih:o_ih + in_dim, :]              # (in_dim, 4H)
            w_hh_l = w_ref[o_hh:o_hh + H, :]                   # (H, 4H)
            b_l = w_ref[o_b:o_b + 1, :]                        # (1, 4H)

            # Hoisted input projection: all T timesteps in one MXU matmul.
            gx = jnp.dot(layer_in, w_ih_l,
                         preferred_element_type=jnp.float32) + b_l   # (T*B, 4H)

            h = jnp.zeros((B, H), jnp.float32)
            c = jnp.zeros((B, H), jnp.float32)
            is_last_layer = (layer == n_layers - 1)
            h_seq = []
            for t in range(T):                                 # static, fully unrolled
                gates = gx[t * B:(t + 1) * B, :] + jnp.dot(
                    h, w_hh_l, preferred_element_type=jnp.float32)    # (B, 4H)
                s = jax.nn.sigmoid(gates)
                if 4 * H <= 128:   # gate row fits one vreg: full-width EUP pass is free
                    g_g = jnp.tanh(gates)[:, 2 * H:3 * H]
                else:              # wider than a vreg: only tanh the g quarter
                    g_g = jnp.tanh(gates[:, 2 * H:3 * H])
                i_g = s[:, 0 * H:1 * H]
                f_g = s[:, 1 * H:2 * H]
                o_g = s[:, 3 * H:4 * H]
                c = f_g * c + i_g * g_g
                h = o_g * jnp.tanh(c)
                if is_last_layer:
                    # Only T of the T*B last-layer rows are consumed: grab them now.
                    for j, (tj, bj) in enumerate(last_tb):
                        if tj == t:
                            last_slices[j] = h[bj:bj + 1, :]
                else:
                    h_seq.append(h)                            # stays in vregs

            if not is_last_layer:
                layer_in = jnp.concatenate(h_seq, axis=0)      # (T*B, H) next input

        last = jnp.concatenate(last_slices, axis=0)            # (T, H)

        # --- final Linear(H -> 1), emitted lane-dense as (1, T) ----------------
        head = w_ref[head_off:head_off + 1, :]                 # (1, 4H)
        w_lin = head[:, :H]                                    # (1, H)
        b_lin = head[:, H:H + 1]                               # (1, 1)
        y = jnp.dot(w_lin, last.T,
                    preferred_element_type=jnp.float32) + b_lin  # (1, T)
        out_ref[...] = y

    return kernel


def covid_predictor_forward(x, params):
    """x: (G, T, B, F) float32 — G independent requests, each already in the
    post-.view() layout (len(sequences), seq_len, n_features).
    Returns y_pred: (G, T, 1)."""
    G, T, B, F = x.shape
    n_layers = len(params["w_ih"])
    H = params["w_hh"][0].shape[0]

    # Guards for the fully-unrolled / vreg-resident strategy (see TODO above).
    assert T * B <= 512, "recurrence is fully unrolled; switch to VMEM scratch + fori_loop"
    assert 4 * H >= H + 1

    # Row-major flatten outside the kernel (matches torch's contiguous memory).
    x_flat = x.reshape(G, T * B, F)
    slab, layer_offs, head_off = _pack_params(params, n_layers, H)
    in_dims = [F] + [H] * (n_layers - 1)
    R = slab.shape[0]

    kernel = _make_kernel(n_layers, T, B, F, H, layer_offs, head_off, in_dims)

    out = pl.pallas_call(
        kernel,
        out_shape=jax.ShapeDtypeStruct((G, 1, T), jnp.float32),
        grid_spec=pltpu.PrefetchScalarGridSpec(
            num_scalar_prefetch=0,
            grid=(G,),
            in_specs=[
                # per-request activation tile (leading request dim squeezed away)
                pl.BlockSpec((None, T * B, F), lambda g: (g, 0, 0)),
                # single packed weight slab, constant across the grid -> fetched once
                pl.BlockSpec((R, 4 * H), lambda g: (0, 0)),
            ],
            out_specs=pl.BlockSpec((None, 1, T), lambda g: (g, 0, 0)),
        ),
        compiler_params=pltpu.CompilerParams(
            dimension_semantics=("parallel",)),   # shards requests across TCs on v7x
    )(x_flat, slab)

    return out.reshape(G, T, 1)


# ----------------------------------------------------------------------------
# Deterministic parameter init (PyTorch-style U(-1/sqrt(H), 1/sqrt(H)))
# ----------------------------------------------------------------------------
def init_params(key, n_features, n_hidden, n_layers):
    scale = 1.0 / float(np.sqrt(n_hidden))
    keys = jax.random.split(key, 4 * n_layers + 2)
    w_ih, w_hh, b = [], [], []
    k = 0
    for layer in range(n_layers):
        in_dim = n_features if layer == 0 else n_hidden
        w_ih.append(jax.random.uniform(keys[k], (in_dim, 4 * n_hidden),
                                       jnp.float32, -scale, scale)); k += 1
        w_hh.append(jax.random.uniform(keys[k], (n_hidden, 4 * n_hidden),
                                       jnp.float32, -scale, scale)); k += 1
        b_ih = jax.random.uniform(keys[k], (1, 4 * n_hidden),
                                  jnp.float32, -scale, scale); k += 1
        b_hh = jax.random.uniform(keys[k], (1, 4 * n_hidden),
                                  jnp.float32, -scale, scale); k += 1
        b.append(b_ih + b_hh)
    w_lin = jax.random.uniform(keys[k], (1, n_hidden),
                               jnp.float32, -scale, scale); k += 1
    b_lin = jax.random.uniform(keys[k], (1, 1), jnp.float32, -scale, scale)
    return {"w_ih": w_ih, "w_hh": w_hh, "b": b, "w_lin": w_lin, "b_lin": b_lin}


# ----------------------------------------------------------------------------
# Pure-JAX reference (mirrors the PyTorch forward exactly, per request)
# ----------------------------------------------------------------------------
def ref_forward(x, params):
    def single(xg):
        T, B, F = xg.shape
        H = params["w_hh"][0].shape[0]
        layer_in = xg
        for layer in range(len(params["w_ih"])):
            w_ih, w_hh, bias = (params["w_ih"][layer], params["w_hh"][layer],
                                params["b"][layer])

            def step(carry, x_t):
                h, c = carry
                gates = x_t @ w_ih + h @ w_hh + bias
                i = jax.nn.sigmoid(gates[:, :H])
                f = jax.nn.sigmoid(gates[:, H:2 * H])
                g = jnp.tanh(gates[:, 2 * H:3 * H])
                o = jax.nn.sigmoid(gates[:, 3 * H:])
                c = f * c + i * g
                h = o * jnp.tanh(c)
                return (h, c), h

            init = (jnp.zeros((B, H), jnp.float32), jnp.zeros((B, H), jnp.float32))
            _, layer_in = jax.lax.scan(step, init, layer_in)
        lstm_out = layer_in                                   # (T, B, H)
        last = jnp.reshape(lstm_out, (B, T, H))[-1]           # torch .view semantics
        return last @ params["w_lin"].T + params["b_lin"]     # (T, 1)

    return jnp.stack([single(x[g]) for g in range(x.shape[0])], axis=0)


# ----------------------------------------------------------------------------
if __name__ == "__main__":
    n_features, n_hidden, seq_len, n_layers = 4, 32, 8, 2
    n_samples = 2    # len(sequences) -> LSTM time axis in the original forward
    n_requests = 4   # independent forward passes batched per pallas_call

    key = jax.random.PRNGKey(0)
    kx, kp = jax.random.split(key)
    # Each request is the post-.view() tensor: (T, seq_len, n_features)
    sequences = jax.random.normal(
        kx, (n_requests, n_samples, seq_len, n_features), jnp.float32)
    params = init_params(kp, n_features, n_hidden, n_layers)

    y = covid_predictor_forward(sequences, params)
    y = jax.block_until_ready(y)

    y_ref = ref_forward(sequences, params)
    np.testing.assert_allclose(np.asarray(y), np.asarray(y_ref), rtol=1e-5, atol=1e-5)
    print("KERNEL_OK")
</pallas_src>

<mosaic_0001>
module attributes {stable_mosaic.version = 11 : i64} {
  func.func @kernel(%arg0: i32, %arg1: memref<1x16x4xf32, #tpu.memory_space<vmem>>, %arg2: memref<128x128xf32, #tpu.memory_space<vmem>>, %arg3: memref<1x1x2xf32, #tpu.memory_space<vmem>>) attributes {dimension_semantics = [#tpu.dimension_semantics<parallel>], iteration_bounds = array<i64: 4>, scalar_prefetch = 0 : i64, scratch_operands = 0 : i64, tpu.core_type = #tpu.core_type<tc>, window_params = [{transform_indices = @transform_0, window_bounds = array<i64: 1, 16, 4>}, {pipeline_mode = #tpu.pipeline_mode<synchronous>, transform_indices = @transform_1, window_bounds = array<i64: 128, 128>}, {transform_indices = @transform_2, window_bounds = array<i64: 1, 1, 2>}]} {
    %c0 = arith.constant 0 : index
    %c0_0 = arith.constant 0 : index
    %c0_1 = arith.constant 0 : index
    %0 = vector.load %arg1[%c0, %c0_0, %c0_1] : memref<1x16x4xf32, #tpu.memory_space<vmem>>, vector<1x16x4xf32>
    %1 = vector.shape_cast %0 : vector<1x16x4xf32> to vector<16x4xf32>
    %c0_2 = arith.constant 0 : index
    %c0_3 = arith.constant 0 : index
    %2 = vector.load %arg2[%c0_2, %c0_3] : memref<128x128xf32, #tpu.memory_space<vmem>>, vector<4x128xf32>
    %c8 = arith.constant 8 : index
    %c0_4 = arith.constant 0 : index
    %3 = vector.load %arg2[%c8, %c0_4] : memref<128x128xf32, #tpu.memory_space<vmem>>, vector<32x128xf32>
    %c40 = arith.constant 40 : index
    %c0_5 = arith.constant 0 : index
    %4 = vector.load %arg2[%c40, %c0_5] : memref<128x128xf32, #tpu.memory_space<vmem>>, vector<1x128xf32>
    %cst = arith.constant dense<0.000000e+00> : vector<16x128xf32>
    %5 = tpu.matmul %1, %2, %cst {dimension_numbers = #tpu.dot_dimension_numbers<[1], [0], [0], [1], [0, 0, 1, 1], [], []>} : vector<16x4xf32>, vector<4x128xf32>, vector<16x128xf32> -> vector<16x128xf32>
    %6 = vector.broadcast %4 : vector<1x128xf32> to vector<16x128xf32>
    %7 = arith.addf %5, %6 : vector<16x128xf32>
    %cst_6 = arith.constant 0.000000e+00 : f32
    %8 = vector.broadcast %cst_6 : f32 to vector<8x32xf32>
    %cst_7 = arith.constant 0.000000e+00 : f32
    %9 = vector.broadcast %cst_7 : f32 to vector<8x32xf32>
    %10 = vector.extract_strided_slice %7 {offsets = [0, 0], sizes = [8, 128], strides = [1, 1]} : vector<16x128xf32> to vector<8x128xf32>
    %cst_8 = arith.constant dense<0.000000e+00> : vector<8x128xf32>
    %11 = tpu.matmul %8, %3, %cst_8 {dimension_numbers = #tpu.dot_dimension_numbers<[1], [0], [0], [1], [0, 0, 1, 1], [], []>} : vector<8x32xf32>, vector<32x128xf32>, vector<8x128xf32> -> vector<8x128xf32>
    %12 = arith.addf %10, %11 : vector<8x128xf32>
    %13 = arith.negf %12 : vector<8x128xf32>
    %14 = math.exp %13 : vector<8x128xf32>
    %cst_9 = arith.constant 1.000000e+00 : f32
    %15 = vector.broadcast %cst_9 : f32 to vector<8x128xf32>
    %16 = arith.addf %15, %14 : vector<8x128xf32>
    %17 = arith.divf %15, %16 : vector<8x128xf32>
    %18 = math.tanh %12 : vector<8x128xf32>
    %19 = vector.extract_strided_slice %18 {offsets = [0, 64], sizes = [8, 32], strides = [1, 1]} : vector<8x128xf32> to vector<8x32xf32>
    %20 = vector.extract_strided_slice %17 {offsets = [0, 0], sizes = [8, 32], strides = [1, 1]} : vector<8x128xf32> to vector<8x32xf32>
    %21 = vector.extract_strided_slice %17 {offsets = [0, 32], sizes = [8, 32], strides = [1, 1]} : vector<8x128xf32> to vector<8x32xf32>
    %22 = vector.extract_strided_slice %17 {offsets = [0, 96], sizes = [8, 32], strides = [1, 1]} : vector<8x128xf32> to vector<8x32xf32>
    %23 = arith.mulf %21, %9 : vector<8x32xf32>
    %24 = arith.mulf %20, %19 : vector<8x32xf32>
    %25 = arith.addf %23, %24 : vector<8x32xf32>
    %26 = math.tanh %25 : vector<8x32xf32>
    %27 = arith.mulf %22, %26 : vector<8x32xf32>
    %28 = vector.extract_strided_slice %7 {offsets = [8, 0], sizes = [8, 128], strides = [1, 1]} : vector<16x128xf32> to vector<8x128xf32>
    %cst_10 = arith.constant dense<0.000000e+00> : vector<8x128xf32>
    %29 = tpu.matmul %27, %3, %cst_10 {dimension_numbers = #tpu.dot_dimension_numbers<[1], [0], [0], [1], [0, 0, 1, 1], [], []>} : vector<8x32xf32>, vector<32x128xf32>, vector<8x128xf32> -> vector<8x128xf32>
    %30 = arith.addf %28, %29 : vector<8x128xf32>
    %31 = arith.negf %30 : vector<8x128xf32>
    %32 = math.exp %31 : vector<8x128xf32>
    %cst_11 = arith.constant 1.000000e+00 : f32
    %33 = vector.broadcast %cst_11 : f32 to vector<8x128xf32>
    %34 = arith.addf %33, %32 : vector<8x128xf32>
    %35 = arith.divf %33, %34 : vector<8x128xf32>
    %36 = math.tanh %30 : vector<8x128xf32>
    %37 = vector.extract_strided_slice %36 {offsets = [0, 64], sizes = [8, 32], strides = [1, 1]} : vector<8x128xf32> to vector<8x32xf32>
    %38 = vector.extract_strided_slice %35 {offsets = [0, 0], sizes = [8, 32], strides = [1, 1]} : vector<8x128xf32> to vector<8x32xf32>
    %39 = vector.extract_strided_slice %35 {offsets = [0, 32], sizes = [8, 32], strides = [1, 1]} : vector<8x128xf32> to vector<8x32xf32>
    %40 = vector.extract_strided_slice %35 {offsets = [0, 96], sizes = [8, 32], strides = [1, 1]} : vector<8x128xf32> to vector<8x32xf32>
    %41 = arith.mulf %39, %25 : vector<8x32xf32>
    %42 = arith.mulf %38, %37 : vector<8x32xf32>
    %43 = arith.addf %41, %42 : vector<8x32xf32>
    %44 = math.tanh %43 : vector<8x32xf32>
    %45 = arith.mulf %40, %44 : vector<8x32xf32>
    %46 = tpu.concatenate %27, %45 in 0 : vector<8x32xf32>, vector<8x32xf32> -> vector<16x32xf32>
    %c48 = arith.constant 48 : index
    %c0_12 = arith.constant 0 : index
    %47 = vector.load %arg2[%c48, %c0_12] : memref<128x128xf32, #tpu.memory_space<vmem>>, vector<32x128xf32>
    %c80 = arith.constant 80 : index
    %c0_13 = arith.constant 0 : index
    %48 = vector.load %arg2[%c80, %c0_13] : memref<128x128xf32, #tpu.memory_space<vmem>>, vector<32x128xf32>
    %c112 = arith.constant 112 : index
    %c0_14 = arith.constant 0 : index
    %49 = vector.load %arg2[%c112, %c0_14] : memref<128x128xf32, #tpu.memory_space<vmem>>, vector<1x128xf32>
    %cst_15 = arith.constant dense<0.000000e+00> : vector<16x128xf32>
    %50 = tpu.matmul %46, %47, %cst_15 {dimension_numbers = #tpu.dot_dimension_numbers<[1], [0], [0], [1], [0, 0, 1, 1], [], []>} : vector<16x32xf32>, vector<32x128xf32>, vector<16x128xf32> -> vector<16x128xf32>
    %51 = vector.broadcast %49 : vector<1x128xf32> to vector<16x128xf32>
    %52 = arith.addf %50, %51 : vector<16x128xf32>
    %cst_16 = arith.constant 0.000000e+00 : f32
    %53 = vector.broadcast %cst_16 : f32 to vector<8x32xf32>
    %cst_17 = arith.constant 0.000000e+00 : f32
    %54 = vector.broadcast %cst_17 : f32 to vector<8x32xf32>
    %55 = vector.extract_strided_slice %52 {offsets = [0, 0], sizes = [8, 128], strides = [1, 1]} : vector<16x128xf32> to vector<8x128xf32>
    %cst_18 = arith.constant dense<0.000000e+00> : vector<8x128xf32>
    %56 = tpu.matmul %53, %48, %cst_18 {dimension_numbers = #tpu.dot_dimension_numbers<[1], [0], [0], [1], [0, 0, 1, 1], [], []>} : vector<8x32xf32>, vector<32x128xf32>, vector<8x128xf32> -> vector<8x128xf32>
    %57 = arith.addf %55, %56 : vector<8x128xf32>
    %58 = arith.negf %57 : vector<8x128xf32>
    %59 = math.exp %58 : vector<8x128xf32>
    %cst_19 = arith.constant 1.000000e+00 : f32
    %60 = vector.broadcast %cst_19 : f32 to vector<8x128xf32>
    %61 = arith.addf %60, %59 : vector<8x128xf32>
    %62 = arith.divf %60, %61 : vector<8x128xf32>
    %63 = math.tanh %57 : vector<8x128xf32>
    %64 = vector.extract_strided_slice %63 {offsets = [0, 64], sizes = [8, 32], strides = [1, 1]} : vector<8x128xf32> to vector<8x32xf32>
    %65 = vector.extract_strided_slice %62 {offsets = [0, 0], sizes = [8, 32], strides = [1, 1]} : vector<8x128xf32> to vector<8x32xf32>
    %66 = vector.extract_strided_slice %62 {offsets = [0, 32], sizes = [8, 32], strides = [1, 1]} : vector<8x128xf32> to vector<8x32xf32>
    %67 = vector.extract_strided_slice %62 {offsets = [0, 96], sizes = [8, 32], strides = [1, 1]} : vector<8x128xf32> to vector<8x32xf32>
    %68 = arith.mulf %66, %54 : vector<8x32xf32>
    %69 = arith.mulf %65, %64 : vector<8x32xf32>
    %70 = arith.addf %68, %69 : vector<8x32xf32>
    %71 = math.tanh %70 : vector<8x32xf32>
    %72 = arith.mulf %67, %71 : vector<8x32xf32>
    %73 = vector.extract_strided_slice %52 {offsets = [8, 0], sizes = [8, 128], strides = [1, 1]} : vector<16x128xf32> to vector<8x128xf32>
    %cst_20 = arith.constant dense<0.000000e+00> : vector<8x128xf32>
    %74 = tpu.matmul %72, %48, %cst_20 {dimension_numbers = #tpu.dot_dimension_numbers<[1], [0], [0], [1], [0, 0, 1, 1], [], []>} : vector<8x32xf32>, vector<32x128xf32>, vector<8x128xf32> -> vector<8x128xf32>
    %75 = arith.addf %73, %74 : vector<8x128xf32>
    %76 = arith.negf %75 : vector<8x128xf32>
    %77 = math.exp %76 : vector<8x128xf32>
    %cst_21 = arith.constant 1.000000e+00 : f32
    %78 = vector.broadcast %cst_21 : f32 to vector<8x128xf32>
    %79 = arith.addf %78, %77 : vector<8x128xf32>
    %80 = arith.divf %78, %79 : vector<8x128xf32>
    %81 = math.tanh %75 : vector<8x128xf32>
    %82 = vector.extract_strided_slice %81 {offsets = [0, 64], sizes = [8, 32], strides = [1, 1]} : vector<8x128xf32> to vector<8x32xf32>
    %83 = vector.extract_strided_slice %80 {offsets = [0, 0], sizes = [8, 32], strides = [1, 1]} : vector<8x128xf32> to vector<8x32xf32>
    %84 = vector.extract_strided_slice %80 {offsets = [0, 32], sizes = [8, 32], strides = [1, 1]} : vector<8x128xf32> to vector<8x32xf32>
    %85 = vector.extract_strided_slice %80 {offsets = [0, 96], sizes = [8, 32], strides = [1, 1]} : vector<8x128xf32> to vector<8x32xf32>
    %86 = arith.mulf %84, %70 : vector<8x32xf32>
    %87 = arith.mulf %83, %82 : vector<8x32xf32>
    %88 = arith.addf %86, %87 : vector<8x32xf32>
    %89 = math.tanh %88 : vector<8x32xf32>
    %90 = arith.mulf %85, %89 : vector<8x32xf32>
    %91 = vector.extract_strided_slice %90 {offsets = [6, 0], sizes = [1, 32], strides = [1, 1]} : vector<8x32xf32> to vector<1x32xf32>
    %92 = vector.extract_strided_slice %90 {offsets = [7, 0], sizes = [1, 32], strides = [1, 1]} : vector<8x32xf32> to vector<1x32xf32>
    %93 = tpu.concatenate %91, %92 in 0 : vector<1x32xf32>, vector<1x32xf32> -> vector<2x32xf32>
    %c120 = arith.constant 120 : index
    %c0_22 = arith.constant 0 : index
    %94 = vector.load %arg2[%c120, %c0_22] : memref<128x128xf32, #tpu.memory_space<vmem>>, vector<1x128xf32>
    %95 = vector.extract_strided_slice %94 {offsets = [0, 0], sizes = [1, 32], strides = [1, 1]} : vector<1x128xf32> to vector<1x32xf32>
    %96 = vector.extract_strided_slice %94 {offsets = [0, 32], sizes = [1, 1], strides = [1, 1]} : vector<1x128xf32> to vector<1x1xf32>
    %97 = tpu.transpose %93, [1, 0] : vector<2x32xf32> -> vector<32x2xf32>
    %cst_23 = arith.constant dense<0.000000e+00> : vector<1x2xf32>
    %98 = tpu.matmul %95, %97, %cst_23 {dimension_numbers = #tpu.dot_dimension_numbers<[1], [0], [0], [1], [0, 0, 1, 1], [], []>} : vector<1x32xf32>, vector<32x2xf32>, vector<1x2xf32> -> vector<1x2xf32>
    %99 = vector.broadcast %96 : vector<1x1xf32> to vector<1x2xf32>
    %100 = arith.addf %98, %99 : vector<1x2xf32>
    %c0_24 = arith.constant 0 : index
    %c0_25 = arith.constant 0 : index
    %c0_26 = arith.constant 0 : index
    %101 = vector.load %arg3[%c0_24, %c0_25, %c0_26] : memref<1x1x2xf32, #tpu.memory_space<vmem>>, vector<1x1x2xf32>
    %102 = vector.shape_cast %101 : vector<1x1x2xf32> to vector<1x2xf32>
    %103 = vector.shape_cast %100 : vector<1x2xf32> to vector<1x1x2xf32>
    tpu.vector_store %arg3[%c0_24, %c0_25, %c0_26], %103 {strides = array<i32>} : memref<1x1x2xf32, #tpu.memory_space<vmem>>, vector<1x1x2xf32>,
    return
  }
  func.func @transform_0(%arg0: i32) -> (i32, i32, i32) {
    %c0_i32 = arith.constant 0 : i32
    %c0_i32_0 = arith.constant 0 : i32
    %c0_i32_1 = arith.constant 0 : i32
    return %arg0, %c0_i32, %c0_i32_0 : i32, i32, i32
  }
  func.func @transform_1(%arg0: i32) -> (i32, i32) {
    %c0_i32 = arith.constant 0 : i32
    %c0_i32_0 = arith.constant 0 : i32
    %c0_i32_1 = arith.constant 0 : i32
    return %c0_i32, %c0_i32_0 : i32, i32
  }
  func.func @transform_2(%arg0: i32) -> (i32, i32, i32) {
    %c0_i32 = arith.constant 0 : i32
    %c0_i32_0 = arith.constant 0 : i32
    %c0_i32_1 = arith.constant 0 : i32
    return %arg0, %c0_i32, %c0_i32_0 : i32, i32, i32
  }
}

</mosaic_0001>

<bundles_post_ra>
// kernel: tpu_custom_call.1
= control target key start
LH: loop header
LB: loop body
LE: loop exit
PB: predicated region body
PF: predicated region fallthrough
CT: control target
= control target key end

     0   :  { %7 = vsyncpa [#allocation3], 0  ;;  %s731_s9 = smov 0   ;;  %s797_s0 = inlined_call_operand.vmem [shape: f32[4,16,4], index: 0, kind: input, shape index: {}]   ;;  %s798_s1 = inlined_call_operand.hbm [shape: f32[128,128], index: 1, kind: input, shape index: {}]   ;;  %s799_s2 = inlined_call_operand.vmem [shape: f32[4,1,2], index: 2, kind: output, shape index: {}]  }
   0x1 LB: > { %s102_s12 = sshll.u32 %s798_s1, 4  ;;  %s581_s13 = sadd.s32 4294967295, %s707_s9   ;;  %s707_s9 = sphi %s731_s9, %s13_s9   ;;  %s103_s12 = int_to_ptr.hbm [resolvable:$true] %s102_s12 }
   0x2   : > { %p583_p0 = scmp.ge.s32.totalorder %s707_s9, 1  ;;  %p91_p1 = scmp.lt.s32.totalorder %s707_s9, 5 }
   0x3   : > { %p614_p2 = scmp.eq.s32.totalorder %s581_s13, 0  ;;  %s709_s14 = smov [#allocation2]  }
   0x4   : > { %p92_p3 = pnand %p583_p0, %p91_p1  ;;  %s104_s15 = sshll.u32 %s709_s14, 4  ;;  %s105_s15 = int_to_ptr.vmem [resolvable:$true] %s104_s15 }
   0x5   : > { %s710_s16 = smov 128   ;;  %s711_s17 = smov 8  }
   0x6   : > { %p610_p4 = pneg %p92_p3  ;;  %128 = sbr.rel (%p92_p3) target bundleno = 1926 (0x786), region = 28 }
   0x8   : > { %p611_p5 = pnand %p614_p2, %p610_p4 }
   0xa   : > { %613 = dma.hbm_to_vmem [thread:$0]  (!%p611_p5), %s103_s12, 2048, %s105_s15, [#allocation3], %s710_s16, %s710_s16, %s711_s17  }
   0xb   : > { %702 = dma.done.wait (%p614_p2), [#allocation3], 2048  }
   0xc   : > { %704 = vsyncadd (%p614_p2), [#allocation3], 4294965248  ;;  %p149_p6 = scmp.lt.s32.totalorder %s581_s13, 3  ;;  %vm173_vm0 = vcmask 1043456   ;;  %vm166_vm1 = vcmask 31744   ;;  %v163_v0 = vld [vmem:[#allocation2 + $0x20] sm:$0xff] }
   0xd   : > { %v162_v1 = vld [vmem:[#allocation2 + $0x18] sm:$0xff]  ;;  %v159_v2 = vld [vmem:[#allocation2] sm:$0xf]  ;;  %216 = vmatpush.msra.mxu1 %v163_v0  ;;  %v161_v4 = vld [vmem:[#allocation2 + $0x10] sm:$0xff]  ;;  %279 = vmatpush.msra.mxu2 %v163_v0  ;;  %v712_v6 = vmov 0.0   ;;  %s713_s22 = smov 64  }
   0xe   : > { %s801_s13 = smov (!%p149_p6, %s581_s13), 3  ;;  %590 = vmatpush.msk.msra.mxu0 %vm173_vm0, %v159_v2  ;;  %v160_v5 = vld [vmem:[#allocation2 + $0x8] sm:$0xff]  ;;  %s714_s23 = smov 32   ;;  %v327_v33 = vld [vmem:[#allocation2 + $0x40] sm:$0xff]  ;;  %v326_v34 = vld [vmem:[#allocation2 + $0x38] sm:$0xff]  ;;  %vm200_vm6 = vcmask 261120  }
   0xf   : > { %s605_s18 = sshll.u32 %s801_s13, 4  ;;  %217 = vmatpush.msra.mxu1 %v162_v1  ;;  %280 = vmatpush.msra.mxu2 %v162_v1  ;;  %v753_v7 = vld [vmem:[#allocation2 + $0x28] ss:$0 sm:$0xff]  ;;  %v325_v35 = vld [vmem:[#allocation2 + $0x30] sm:$0xff]  ;;  %v331_v39 = vld [vmem:[#allocation2 + $0x60] sm:$0xff]  ;;  %s156_s26 = scalar_lea.vmem %s799_s2, %s801_s13 }
  0x10   : > { %s748_s21 = scalar_lea.vmem %s797_s0, %s605_s18  ;;  %v328_v32 = vld [vmem:[#allocation2 + $0x48] sm:$0xff]  ;;  %v330_v41 = vld [vmem:[#allocation2 + $0x58] sm:$0xff]  ;;  %v329_v42 = vld [vmem:[#allocation2 + $0x50] sm:$0xff] }
  0x11   : > { %v157_v3 = vld [vmem:[%s748_s21] sm:$0xff]  ;;  %218 = vmatpush.msra.mxu1 %v161_v4  ;;  %281 = vmatpush.msra.mxu2 %v161_v4  ;;  %v332_v38 = vld [vmem:[#allocation2 + $0x68] sm:$0xff]  ;;  %v769_v46 = vld [vmem:[#allocation2 + $0x70] ss:$0 sm:$0xff] }
  0x12   : > { %591 = vmatmul.msk.f32.vlgmr.msra.gmra.mxu0 %vm166_vm1, %v157_v3  ;;  %352 = vmatpush.msra.mxu3 %v328_v32  ;;  %v158_v40 = vld [vmem:[%s748_s21 + $0x8] sm:$0xff] }
  0x13   : > { %219 = vmatpush.msra.mxu1 %v160_v5  ;;  %282 = vmatpush.msra.mxu2 %v160_v5 }
  0x14   : > { %220 = vmatmul.f32.vlgmr.msra.gmra.mxu1 %v712_v6  ;;  %353 = vmatpush.msra.mxu3 %v327_v33 }
  0x15   : > { %375 = vmatpush.msrb.mxu1 %v332_v38  ;;  %438 = vmatpush.msrb.mxu2 %v332_v38 }
  0x16   : > { %354 = vmatpush.msra.mxu3 %v326_v34 }
  0x17   : > { %376 = vmatpush.msrb.mxu1 %v331_v39  ;;  %439 = vmatpush.msrb.mxu2 %v331_v39 }
  0x18   : > { %355 = vmatpush.msra.mxu3 %v325_v35 }
  0x19   : > { %377 = vmatpush.msrb.mxu1 %v330_v41  ;;  %440 = vmatpush.msrb.mxu2 %v330_v41 }
  0x1a   : > { %592 = vmatmul.msk.f32.gmra.mxu0 %vm166_vm1, %v158_v40 }
  0x1b   : > { %378 = vmatpush.msrb.mxu1 %v329_v42  ;;  %441 = vmatpush.msrb.mxu2 %v329_v42 }
  0x1c   : > { %379 = vmatmul.f32.vlgmr.msrb.gmra.mxu1 %v712_v6 }
  0x8f   : > { %v194_v8 = vpop.f32.mrf.mxu0 }
  0x90   : > { %v195_v9 = vadd.f32 %v753_v7, %v194_v8 }
  0x91   : > { %v221_v10 = vpop.f32.mrf.mxu1 }
  0x92   : > { %v224_v11 = vadd.f32 %v221_v10, %v195_v9 }
  0x94   : > { %635 = vtanh.f32 %v224_v11  ;;  %v593_v13 = vmul.f32 -1.442695, %v224_v11 }
  0x96   : > { %637 = vpow2.f32 %v593_v13 }
  0x97   : > { %v197_v44 = vpop.f32.mrf.mxu0 }
  0x98   : > { %v198_v45 = vadd.f32 %v753_v7, %v197_v44 }
  0x99   : > { %v380_v51 = vpop.f32.mrf.mxu1 }
  0x9a   : > { %v636_v12 = vpop.eup %635 }
  0x9b   : > { %247 = vrot.lane.b32.xlu0 %v636_v12, %s713_s22 }
  0x9c   : > { %v638_v14 = vpop.eup %637 }
  0x9d   : > { %v228_v15 = vadd.f32 1.0, %v638_v14 }
  0x9f   : > { %639 = vrcp.f32 %v228_v15  ;;  %v240_v21 = vand.u32 2147483648, %v228_v15  ;;  %vm234_vm3 = vweird.f32 %v228_v15  ;;  %v238_v22 = vand.u32 2147483647, %v228_v15 }
  0xa1   : > { %v241_v24 = vor.u32 1.1754944e-38, %v240_v21  ;;  %vm239_vm5 = vcmp.eq.f32.partialorder %v238_v22, 8.507059e+37 }
  0xa5   : > { %v640_v16 = vpop.eup %639 }
  0xa6   : > { %v230_v17 = vmul.f32 %v640_v16, %v228_v15  ;;  %vm235_vm2 = vweird.f32 %v640_v16 }
  0xa7   : > { %vm236_vm4 = vmor %vm234_vm3, %vm235_vm2  ;;  %vm520_vm3 = vcmask 8192  }
  0xa8   : > { %v231_v18 = vsub.f32 1.0, %v230_v17 }
  0xaa   : > { %v232_v19 = vmul.f32 %v640_v16, %v231_v18 }
  0xac   : > { %v233_v20 = vadd.f32 %v640_v16, %v232_v19 }
  0xae   : > { %v237_v23 = vsel %vm236_vm4, %v640_v16, %v233_v20 }
  0xaf   : > { %v242_v26 = vsel %vm239_vm5, %v241_v24, %v237_v23 }
  0xb0   : > { %v245_v28 = vmul.f32 0.0, %v242_v26 }
 0x10d   : > { %v248_v25 = vpop.permute.xlu0 %247 }
 0x10e   : > { %v250_v27 = vmul.f32 %v248_v25, %v242_v26 }
 0x110   : > { %252 = vrot.lane.b32.xlu0 %v250_v27, %s714_s23 }
 0x182   : > { %v253_v29 = vpop.permute.xlu0 %252 }
 0x183   : > { %v758_v30 = vadd.f32 %v253_v29, %v245_v28 }
 0x185   : > { %641 = vtanh.f32 %v758_v30 }
 0x18b   : > { %v642_v31 = vpop.eup %641 }
 0x18c   : > { %258 = vrot.lane.b32.xlu1 %v642_v31, %s713_s22 }
 0x1fe   : > { %v259_v36 = vpop.permute.xlu1 %258 }
 0x1ff   : > { %v261_v37 = vmul.f32 %v259_v36, %v242_v26 }
 0x201   : > { %263 = vrot.lane.b32.xlu1 %v261_v37, %s714_s23 }
 0x273   : > { %v264_v43 = vpop.permute.xlu1 %263 }
 0x274   : > { %594 = vmatmul.msk.f32.vlgmr.msra.gmra.mxu2 %vm200_vm6, %v264_v43  ;;  %596 = vmatmul.msk.f32.vlgmr.msra.gmra.mxu3 %vm200_vm6, %v264_v43 }
 0x2f7   : > { %v284_v47 = vpop.f32.mrf.mxu2  ;;  %v357_v48 = vpop.f32.mrf.mxu3 }
 0x2f8   : > { %v287_v49 = vadd.f32 %v284_v47, %v198_v45  ;;  %v358_v50 = vadd.f32 %v769_v46, %v357_v48 }
 0x2fa   : > { %643 = vtanh.f32 %v287_v49  ;;  %v383_v52 = vadd.f32 %v380_v51, %v358_v50  ;;  %v595_v55 = vmul.f32 -1.442695, %v287_v49 }
 0x2fc   : > { %645 = vtanh.f32 %v383_v52  ;;  %v598_v56 = vmul.f32 -1.442695, %v383_v52 }
 0x2fd   : > { %647 = vpow2.f32 %v595_v55 }
 0x2fe   : > { %649 = vpow2.f32 %v598_v56 }
 0x300   : > { %v644_v53 = vpop.eup %643 }
 0x301   : > { %310 = vrot.lane.b32.xlu2 %v644_v53, %s713_s22 }
 0x302   : > { %v646_v54 = vpop.eup %645 }
 0x303   : > { %v648_v57 = vpop.eup %647 }
 0x304   : > { %v291_v58 = vadd.f32 1.0, %v648_v57  ;;  %v650_v59 = vpop.eup %649 }
 0x305   : > { %v387_v60 = vadd.f32 1.0, %v650_v59 }
 0x306   : > { %651 = vrcp.f32 %v291_v58  ;;  %v303_v5 = vand.u32 2147483648, %v291_v58  ;;  %vm297_vm8 = vweird.f32 %v291_v58  ;;  %v301_v6 = vand.u32 2147483647, %v291_v58 }
 0x307   : > { %653 = vrcp.f32 %v387_v60  ;;  %v399_v14 = vand.u32 2147483648, %v387_v60  ;;  %vm393_vm12 = vweird.f32 %v387_v60  ;;  %v397_v15 = vand.u32 2147483647, %v387_v60 }
 0x308   : > { %v304_v9 = vor.u32 1.1754944e-38, %v303_v5  ;;  %vm302_vm10 = vcmp.eq.f32.partialorder %v301_v6, 8.507059e+37 }
 0x309   : > { %406 = vrot.lane.b32.xlu2 %v646_v54, %s713_s22  ;;  %v400_v17 = vor.u32 1.1754944e-38, %v399_v14  ;;  %vm398_vm14 = vcmp.eq.f32.partialorder %v397_v15, 8.507059e+37 }
 0x30c   : > { %v652_v61 = vpop.eup %651 }
 0x30d   : > { %v293_v62 = vmul.f32 %v652_v61, %v291_v58  ;;  %v654_v0 = vpop.eup %653  ;;  %vm298_vm7 = vweird.f32 %v652_v61 }
 0x30e   : > { %v389_v2 = vmul.f32 %v654_v0, %v387_v60  ;;  %vm299_vm9 = vmor %vm297_vm8, %vm298_vm7  ;;  %vm394_vm11 = vweird.f32 %v654_v0 }
 0x30f   : > { %v294_v63 = vsub.f32 1.0, %v293_v62  ;;  %vm395_vm13 = vmor %vm393_vm12, %vm394_vm11  ;;  %v487_v62 = vld [vmem:[#allocation2 + $0x78] sm:$0x1] }
 0x310   : > { %v390_v4 = vsub.f32 1.0, %v389_v2 }
 0x311   : > { %v295_v1 = vmul.f32 %v652_v61, %v294_v63  ;;  %v715_v63 = vmov 32  }
 0x312   : > { %v391_v8 = vmul.f32 %v654_v0, %v390_v4  ;;  %631 = vset.pattern.permute.xlu1 %v715_v63  ;;  %632 = vset.pattern.permute.xlu0 %v715_v63 }
 0x313   : > { %v296_v3 = vadd.f32 %v652_v61, %v295_v1 }
 0x314   : > { %v392_v13 = vadd.f32 %v654_v0, %v391_v8 }
 0x315   : > { %v300_v7 = vsel %vm299_vm9, %v652_v61, %v296_v3 }
 0x316   : > { %v305_v11 = vsel %vm302_vm10, %v304_v9, %v300_v7  ;;  %v396_v16 = vsel %vm395_vm13, %v654_v0, %v392_v13 }
 0x317   : > { %v401_v18 = vsel %vm398_vm14, %v400_v17, %v396_v16  ;;  %v308_v21 = vmul.f32 %v305_v11, %v758_v30 }
 0x318   : > { %v404_v24 = vmul.f32 0.0, %v401_v18 }
 0x35b   : > { %v311_v10 = vpop.permute.xlu2 %310 }
 0x35c   : > { %v313_v12 = vmul.f32 %v311_v10, %v305_v11 }
 0x35e   : > { %315 = vrot.lane.b32.xlu0 %v313_v12, %s714_s23 }
 0x363   : > { %v407_v19 = vpop.permute.xlu2 %406 }
 0x364   : > { %v409_v20 = vmul.f32 %v407_v19, %v401_v18 }
 0x366   : > { %411 = vrot.lane.b32.xlu1 %v409_v20, %s714_s23 }
 0x3d0   : > { %v316_v22 = vpop.permute.xlu0 %315 }
 0x3d1   : > { %v318_v23 = vadd.f32 %v316_v22, %v308_v21 }
 0x3d3   : > { %655 = vtanh.f32 %v318_v23 }
 0x3d8   : > { %v412_v25 = vpop.permute.xlu1 %411 }
 0x3d9   : > { %v656_v26 = vpop.eup %655  ;;  %v414_v27 = vadd.f32 %v412_v25, %v404_v24 }
 0x3da   : > { %321 = vrot.lane.b32.xlu2 %v656_v26, %s713_s22 }
 0x3db   : > { %657 = vtanh.f32 %v414_v27 }
 0x3e1   : > { %v658_v28 = vpop.eup %657 }
 0x3e2   : > { %417 = vrot.lane.b32.xlu0 %v658_v28, %s713_s22 }
 0x434   : > { %v322_v29 = vpop.permute.xlu2 %321 }
 0x435   : > { %v324_v31 = vmul.f32 %v322_v29, %v305_v11 }
 0x437   : > { %336 = vrot.lane.b32.xlu1 %v324_v31, %s714_s23 }
 0x454   : > { %v418_v32 = vpop.permute.xlu0 %417 }
 0x455   : > { %v420_v33 = vmul.f32 %v418_v32, %v401_v18 }
 0x457   : > { %422 = vrot.lane.b32.xlu2 %v420_v33, %s714_s23 }
 0x4a9   : > { %v337_v30 = vpop.permute.xlu1 %336 }
 0x4aa   : > { %597 = vmatmul.msk.f32.gmra.mxu3 %vm200_vm6, %v337_v30 }
 0x4b1   : > { %v423_v34 = vpop.permute.xlu2 %422 }
 0x4b2   : > { %599 = vmatmul.msk.f32.vlgmr.msrb.gmra.mxu2 %vm200_vm6, %v423_v34 }
 0x52d   : > { %v360_v35 = vpop.f32.mrf.mxu3 }
 0x52e   : > { %v361_v36 = vadd.f32 %v769_v46, %v360_v35 }
 0x535   : > { %v443_v37 = vpop.f32.mrf.mxu2 }
 0x536   : > { %v446_v38 = vadd.f32 %v443_v37, %v361_v36 }
 0x538   : > { %659 = vtanh.f32 %v446_v38  ;;  %v600_v40 = vmul.f32 -1.442695, %v446_v38 }
 0x53a   : > { %661 = vpow2.f32 %v600_v40 }
 0x53e   : > { %v660_v39 = vpop.eup %659 }
 0x53f   : > { %469 = vrot.lane.b32.xlu0 %v660_v39, %s713_s22 }
 0x540   : > { %v662_v41 = vpop.eup %661 }
 0x541   : > { %v450_v42 = vadd.f32 1.0, %v662_v41 }
 0x543   : > { %663 = vrcp.f32 %v450_v42  ;;  %v462_v49 = vand.u32 2147483648, %v450_v42  ;;  %vm456_vm0 = vweird.f32 %v450_v42  ;;  %v460_v46 = vand.u32 2147483647, %v450_v42 }
 0x545   : > { %v463_v51 = vor.u32 1.1754944e-38, %v462_v49  ;;  %vm461_vm2 = vcmp.eq.f32.partialorder %v460_v46, 8.507059e+37 }
 0x549   : > { %v664_v43 = vpop.eup %663 }
 0x54a   : > { %v452_v44 = vmul.f32 %v664_v43, %v450_v42  ;;  %vm457_vm15 = vweird.f32 %v664_v43 }
 0x54b   : > { %vm458_vm1 = vmor %vm456_vm0, %vm457_vm15 }
 0x54c   : > { %v453_v45 = vsub.f32 1.0, %v452_v44 }
 0x54e   : > { %v454_v47 = vmul.f32 %v664_v43, %v453_v45 }
 0x550   : > { %v455_v48 = vadd.f32 %v664_v43, %v454_v47 }
 0x552   : > { %v459_v50 = vsel %vm458_vm1, %v664_v43, %v455_v48 }
 0x553   : > { %v464_v53 = vsel %vm461_vm2, %v463_v51, %v459_v50 }
 0x554   : > { %v467_v55 = vmul.f32 %v464_v53, %v414_v27 }
 0x5b1   : > { %v470_v52 = vpop.permute.xlu0 %469 }
 0x5b2   : > { %v472_v54 = vmul.f32 %v470_v52, %v464_v53 }
 0x5b4   : > { %474 = vrot.lane.b32.xlu1 %v472_v54, %s714_s23 }
 0x5bc   : > { %490 = vperm.xlu1 %631, %v487_v62  }
 0x626   : > { %v475_v56 = vpop.permute.xlu1 %474 }
 0x627   : > { %v477_v57 = vadd.f32 %v475_v56, %v467_v55 }
 0x629   : > { %665 = vtanh.f32 %v477_v57 }
 0x62e   : > { %v491_v1 = vpop.permute.xlu1 %490 }
 0x62f   : > { %v666_v58 = vpop.eup %665 }
 0x630   : > { %480 = vrot.lane.b32.xlu2 %v666_v58, %s713_s22 }
 0x68a   : > { %v481_v59 = vpop.permute.xlu2 %480 }
 0x68b   : > { %v483_v60 = vmul.f32 %v481_v59, %v464_v53 }
 0x68d   : > { %v485_v61 = vrot.slane %v483_v60, 6 }
 0x68f   : > { %494 = vrot.lane.b32.xlu0 %v485_v61, %s714_s23 }
 0x701   : > { %v495_v0 = vpop.permute.xlu0 %494 }
 0x702   : > { %601 = vmatpush.xpose.msk.msrb.mxu0 %vm200_vm6, %v495_v0 }
 0x705   : > { %602 = vmatmul.msk.f32.vlgmr.msrb.gmra.mxu0 %vm200_vm6, %v487_v62 }
 0x782   : > { %v517_v2 = vpop.f32.mrf.mxu0 }
 0x783   : > { %v518_v3 = vadd.f32 %v517_v2, %v491_v1 }
 0x785   : > { %521 = vst.msk [vmem:[%s156_s26] sm:$0x1] %vm520_vm3, %v518_v3 }
 0x786 PF: > { %s13_s9 = sadd.s32 1, %s707_s9  }
 0x787   : > { %p10_p7 = scmp.ge.s32.totalorder %s13_s9, 6  }
 0x789   :  { %12 = sbr.rel (!%p10_p7) target bundleno = 1 (0x1), region = 63 }
 0x78e   :  { %539 = vsyncpa [#allocation3], 1 }
 0x78f   :  { %541 = vsyncpa [#allocation3 + $0x1], 1 }

</bundles_post_ra>
